<compile_context>
chip_gen: v7x
topology: tpu7x:2x2x1
jax: 0.10.0
libtpu: 0.0.40
codegen_flags: <defaults>
</compile_context>

<pallas_src>
import functools
import math

import jax
import jax.numpy as jnp
import numpy as np
from jax import lax
from jax.experimental import pallas as pl
from jax.experimental.pallas import tpu as pltpu


# ---------------------------------------------------------------------------
# helpers
# ---------------------------------------------------------------------------
def _pick_tile(dim, preferred, align):
    """Largest `align`-multiple divisor of `dim` that is <= preferred (or full dim)."""
    if dim <= preferred:
        return dim                      # full extent is always a legal block dim
    t = (preferred // align) * align
    while t >= align:
        if dim % t == 0:
            return t
        t -= align
    return dim                          # fallback: whole dimension


def make_cas_matrix(n):
    """C[i, j] = cos(2*pi*i*j/n) + sin(2*pi*i*j/n)  (symmetric DHT 'cas' matrix)."""
    ar = jnp.arange(n)
    nk = (ar[:, None] * ar[None, :]) % n          # exact integer arithmetic
    ang = (2.0 * math.pi / n) * nk.astype(jnp.float32)
    return jnp.cos(ang) + jnp.sin(ang)


def make_freq_band_weights(n):
    """apply_frequency_band_weights: 1.0 everywhere, 0.5 where |freq| > 0.24."""
    f = jnp.fft.fftfreq(n).astype(jnp.float32)
    mag = jnp.sqrt(f[:, None] ** 2 + f[None, :] ** 2)
    return jnp.where(mag > 0.24, 0.5, 1.0).astype(jnp.float32)


# ---------------------------------------------------------------------------
# Kernel 1: W_eff = W + delta_w^T   (parameter-side, run once per weight update)
#   delta_w^T[l, k] = freq_w^T[l, k] * (U @ V)[l, k]
#     U = C[:, cols]                            (n, nf)
#     V = C[rows, :] * (spectrum * 71/n^2)[:,None]  (nf, n)   <- scale pre-folded
#   W_eff is kept in (out_features, in_features) layout so no transpose of the
#   base weight is ever materialized.
# ---------------------------------------------------------------------------
def _w_eff_kernel(w_ref, u_ref, v_ref, fwt_ref, o_ref):
    d = jnp.dot(u_ref[...], v_ref[...], preferred_element_type=jnp.float32)
    o_ref[...] = (w_ref[...].astype(jnp.float32) + fwt_ref[...] * d).astype(o_ref.dtype)


def build_w_eff(W, cas, rows, cols, spectrum, freq_w, *, tn=256, tk=256,
                out_dtype=jnp.float32):
    n_out, n_in = W.shape
    assert n_out == n_in, "Fourier adapter requires out_features == in_features"
    n = n_in
    nf = spectrum.shape[0]
    scale = 71.0 / float(n * n)                      # fold x71 and 1/n^2 once

    U = jnp.take(cas, cols, axis=1)                                  # (n, nf)
    V = jnp.take(cas, rows, axis=0) * (spectrum * scale)[:, None]    # (nf, n)
    fwT = freq_w.T                                                   # (n, n)

    tn = _pick_tile(n, tn, 8)
    tk = _pick_tile(n, tk, 128)
    grid = (n // tn, n // tk)

    return pl.pallas_call(
        _w_eff_kernel,
        out_shape=jax.ShapeDtypeStruct((n, n), out_dtype),
        grid_spec=pltpu.PrefetchScalarGridSpec(
            num_scalar_prefetch=0,
            grid=grid,
            in_specs=[
                pl.BlockSpec((tn, tk), lambda i, j: (i, j)),   # W  (out, in)
                pl.BlockSpec((tn, nf), lambda i, j: (i, 0)),   # U
                pl.BlockSpec((nf, tk), lambda i, j: (0, j)),   # V
                pl.BlockSpec((tn, tk), lambda i, j: (i, j)),   # freq_w^T
            ],
            out_specs=pl.BlockSpec((tn, tk), lambda i, j: (i, j)),
        ),
        compiler_params=pltpu.CompilerParams(
            dimension_semantics=("parallel", "parallel"),
            vmem_limit_bytes=32 * 1024 * 1024,
        ),
    )(W, U, V, fwT)


# ---------------------------------------------------------------------------
# Kernel 2: fused forward  out = x @ W_eff^T + b   (single tiled K-accumulated
# matmul; W_eff already contains the Fourier delta).
# ---------------------------------------------------------------------------
def _forward_kernel(x_ref, w_ref, b_ref, o_ref, acc_ref, *, compute_dtype):
    k = pl.program_id(2)

    @pl.when(k == 0)
    def _init():
        acc_ref[...] = jnp.zeros_like(acc_ref)

    xv = x_ref[...].astype(compute_dtype)
    wv = w_ref[...].astype(compute_dtype)
    # W_eff is (N, K): contract both operands on their last (K) axis -> (tm, tn)
    acc_ref[...] += lax.dot_general(
        xv, wv,
        dimension_numbers=(((1,), (1,)), ((), ())),
        preferred_element_type=jnp.float32,
    )

    @pl.when(k == pl.num_programs(2) - 1)
    def _finalize():
        o_ref[...] = (acc_ref[...] + b_ref[...].astype(jnp.float32)).astype(o_ref.dtype)


def fourier_linear_forward(x, w_eff, b, *, tm=256, tn=256, tk=512,
                           compute_dtype=None):
    B, S, K = x.shape
    N, K2 = w_eff.shape
    assert K == K2, "w_eff must be (out_features, in_features)"
    if compute_dtype is None:
        compute_dtype = x.dtype

    M = B * S
    x2 = x.reshape(M, K)

    tm = _pick_tile(M, tm, 8)
    tn = _pick_tile(N, tn, 128)
    tk = _pick_tile(K, tk, 128)
    grid = (M // tm, N // tn, K // tk)

    kernel = functools.partial(_forward_kernel, compute_dtype=compute_dtype)

    out = pl.pallas_call(
        kernel,
        out_shape=jax.ShapeDtypeStruct((M, N), x.dtype),
        grid_spec=pltpu.PrefetchScalarGridSpec(
            num_scalar_prefetch=0,
            grid=grid,
            in_specs=[
                pl.BlockSpec((tm, tk), lambda i, j, k: (i, k)),   # x tile
                pl.BlockSpec((tn, tk), lambda i, j, k: (j, k)),   # W_eff tile (N,K)
                pl.BlockSpec((1, tn), lambda i, j, k: (0, j)),    # bias tile
            ],
            out_specs=pl.BlockSpec((tm, tn), lambda i, j, k: (i, j)),
            scratch_shapes=[pltpu.VMEM((tm, tn), jnp.float32)],
        ),
        compiler_params=pltpu.CompilerParams(
            dimension_semantics=("parallel", "parallel", "arbitrary"),
            vmem_limit_bytes=32 * 1024 * 1024,
        ),
    )(x2, w_eff, b.reshape(1, N))
    return out.reshape(B, S, N)


# ---------------------------------------------------------------------------
# Pure-JAX reference (FFT-based DHT, mirrors the PyTorch code) for validation
# ---------------------------------------------------------------------------
def _dht1_ref(x):
    X = jnp.fft.fft(x, axis=-1)
    return (X.real - X.imag) / x.shape[-1]


def _dht2_ref(x, freq_w):
    x = _dht1_ref(x)
    x = _dht1_ref(jnp.swapaxes(x, -1, -2))
    x = jnp.swapaxes(x, -1, -2)
    return x * freq_w


if __name__ == "__main__":
    # Small shapes consistent with the module (out_features == in_features).
    B, S = 2, 8
    hidden = 256            # in_features == out_features
    n_frequency = 64

    key = jax.random.PRNGKey(0)
    k_x, k_w, k_b, k_spec, k_idx = jax.random.split(key, 5)

    x = jax.random.normal(k_x, (B, S, hidden), dtype=jnp.float32)
    W = jax.random.normal(k_w, (hidden, hidden), dtype=jnp.float32) * 0.02  # (out, in)
    b = jax.random.normal(k_b, (hidden,), dtype=jnp.float32) * 0.1
    spectrum = jax.random.normal(k_spec, (n_frequency,), dtype=jnp.float32)

    # TODO(synk): energy_and_cumulative_random_selection (init-time, torch-RNG
    # dependent) not reproduced bit-exactly; deterministic unique indices instead.
    flat_idx = jax.random.choice(
        k_idx, hidden * hidden, shape=(n_frequency,), replace=False
    )
    rows = (flat_idx // hidden).astype(jnp.int32)
    cols = (flat_idx % hidden).astype(jnp.int32)

    cas = make_cas_matrix(hidden)                 # symmetric DHT matrix
    freq_w = make_freq_band_weights(hidden)       # frequency-band weights

    # --- Pallas fast path (W_eff built once per weight update, cached) -------
    # f32 MXU operands (exact-semantics path)
    w_eff = build_w_eff(W, cas, rows, cols, spectrum, freq_w, tn=128, tk=128)
    result = fourier_linear_forward(x, w_eff, b, tm=256, tn=128, tk=128)
    result = jax.block_until_ready(result)

    # bf16 MXU operands with f32 accumulation (v5e/v6e/v7x MXU-native path)
    w_eff_bf16 = build_w_eff(W, cas, rows, cols, spectrum, freq_w,
                             tn=128, tk=128, out_dtype=jnp.bfloat16)
    result_bf16 = fourier_linear_forward(x, w_eff_bf16, b, tm=256, tn=128, tk=128,
                                         compute_dtype=jnp.bfloat16)
    result_bf16 = jax.block_until_ready(result_bf16)

    # --- reference path (module semantics via FFT-based DHT) -----------------
    # TODO(synk): self.delta_w_stats (host-side mean/var diagnostics) not emitted.
    dense_s = jnp.zeros((hidden, hidden), jnp.float32).at[rows, cols].set(spectrum)
    delta_w_ref = _dht2_ref(dense_s, freq_w) * 71.0
    result_ref = (
        jnp.einsum("ijk,kl->ijl", x, W.T)
        + b
        + jnp.einsum("ijk,kl->ijl", x, delta_w_ref)
    )

    np.testing.assert_allclose(
        np.asarray(result), np.asarray(result_ref), rtol=2e-3, atol=2e-3
    )
    np.testing.assert_allclose(
        np.asarray(result_bf16), np.asarray(result_ref), rtol=5e-2, atol=5e-2
    )
    print("KERNEL_OK")
</pallas_src>

<mosaic_0001>
module attributes {stable_mosaic.version = 11 : i64} {
  func.func @_w_eff_kernel(%arg0: i32, %arg1: i32, %arg2: memref<128x128xf32, #tpu.memory_space<vmem>>, %arg3: memref<128x64xf32, #tpu.memory_space<vmem>>, %arg4: memref<64x128xf32, #tpu.memory_space<vmem>>, %arg5: memref<128x128xf32, #tpu.memory_space<vmem>>, %arg6: memref<128x128xf32, #tpu.memory_space<vmem>>) attributes {dimension_semantics = [#tpu.dimension_semantics<parallel>, #tpu.dimension_semantics<parallel>], iteration_bounds = array<i64: 2, 2>, scalar_prefetch = 0 : i64, scratch_operands = 0 : i64, tpu.core_type = #tpu.core_type<tc>, window_params = [{transform_indices = @transform_0, window_bounds = array<i64: 128, 128>}, {transform_indices = @transform_1, window_bounds = array<i64: 128, 64>}, {transform_indices = @transform_2, window_bounds = array<i64: 64, 128>}, {transform_indices = @transform_3, window_bounds = array<i64: 128, 128>}, {transform_indices = @transform_4, window_bounds = array<i64: 128, 128>}]} {
    %c0 = arith.constant 0 : index
    %c0_0 = arith.constant 0 : index
    %0 = vector.load %arg3[%c0, %c0_0] : memref<128x64xf32, #tpu.memory_space<vmem>>, vector<128x64xf32>
    %c0_1 = arith.constant 0 : index
    %c0_2 = arith.constant 0 : index
    %1 = vector.load %arg4[%c0_1, %c0_2] : memref<64x128xf32, #tpu.memory_space<vmem>>, vector<64x128xf32>
    %cst = arith.constant dense<0.000000e+00> : vector<128x128xf32>
    %2 = tpu.matmul %0, %1, %cst {dimension_numbers = #tpu.dot_dimension_numbers<[1], [0], [0], [1], [0, 0, 1, 1], [], []>} : vector<128x64xf32>, vector<64x128xf32>, vector<128x128xf32> -> vector<128x128xf32>
    %c0_3 = arith.constant 0 : index
    %c0_4 = arith.constant 0 : index
    %3 = vector.load %arg2[%c0_3, %c0_4] : memref<128x128xf32, #tpu.memory_space<vmem>>, vector<128x128xf32>
    %c0_5 = arith.constant 0 : index
    %c0_6 = arith.constant 0 : index
    %4 = vector.load %arg5[%c0_5, %c0_6] : memref<128x128xf32, #tpu.memory_space<vmem>>, vector<128x128xf32>
    %5 = arith.mulf %4, %2 : vector<128x128xf32>
    %6 = arith.addf %3, %5 : vector<128x128xf32>
    %c0_7 = arith.constant 0 : index
    %c0_8 = arith.constant 0 : index
    %7 = vector.load %arg6[%c0_7, %c0_8] : memref<128x128xf32, #tpu.memory_space<vmem>>, vector<128x128xf32>
    tpu.vector_store %arg6[%c0_7, %c0_8], %6 {strides = array<i32>} : memref<128x128xf32, #tpu.memory_space<vmem>>, vector<128x128xf32>,
    return
  }
  func.func @transform_0(%arg0: i32, %arg1: i32) -> (i32, i32) {
    %c0_i32 = arith.constant 0 : i32
    return %arg0, %arg1 : i32, i32
  }
  func.func @transform_1(%arg0: i32, %arg1: i32) -> (i32, i32) {
    %c0_i32 = arith.constant 0 : i32
    %c0_i32_0 = arith.constant 0 : i32
    return %arg0, %c0_i32 : i32, i32
  }
  func.func @transform_2(%arg0: i32, %arg1: i32) -> (i32, i32) {
    %c0_i32 = arith.constant 0 : i32
    %c0_i32_0 = arith.constant 0 : i32
    return %c0_i32, %arg1 : i32, i32
  }
  func.func @transform_3(%arg0: i32, %arg1: i32) -> (i32, i32) {
    %c0_i32 = arith.constant 0 : i32
    return %arg0, %arg1 : i32, i32
  }
  func.func @transform_4(%arg0: i32, %arg1: i32) -> (i32, i32) {
    %c0_i32 = arith.constant 0 : i32
    return %arg0, %arg1 : i32, i32
  }
}

</mosaic_0001>

<bundles_post_ra>
// kernel: tpu_custom_call.1
= control target key start
LH: loop header
LB: loop body
LE: loop exit
PB: predicated region body
PF: predicated region fallthrough
CT: control target
= control target key end

     0   :  { %s1675_s0 = inlined_call_operand.hbm [shape: f32[256,256], index: 0, kind: input, shape index: {}]   ;;  %s1676_s1 = inlined_call_operand.vmem [shape: f32[256,64], index: 1, kind: input, shape index: {}]   ;;  %s1677_s2 = inlined_call_operand.vmem [shape: f32[64,256], index: 2, kind: input, shape index: {}]   ;;  %s1678_s3 = inlined_call_operand.hbm [shape: f32[256,256], index: 3, kind: input, shape index: {}]   ;;  %s1679_s4 = inlined_call_operand.hbm [shape: f32[256,256], index: 4, kind: output, shape index: {}]  }
   0x1   :  { %1689 = sst [smem:[#allocation19_spill]] %s1675_s0 }
   0x2   :  { %9 = vsyncpa [#allocation3], 0 }
   0x3   :  { %11 = vsyncpa [#allocation3 + $0x1], 0 }
   0x4   :  { %12 = vsyncpa [#allocation7], 0 }
   0x5   :  { %14 = vsyncpa [#allocation7 + $0x1], 0 }
   0x6   :  { %15 = vsyncpa [#allocation4], 0 }
   0x7   :  { %17 = vsyncpa [#allocation4 + $0x1], 0  ;;  %s1283_s15 = smov 0   ;;  %s1285_s16 = smov 0  }
   0x8   :  { %s1287_s17 = smov 0   ;;  %s1289_s18 = smov 0  }
   0x9   :  { %s1291_s19 = smov 0   ;;  %s1293_s20 = smov 0  }
   0xa   :  { %s1295_s21 = smov 0   ;;  %s1297_s22 = smov 0  }
   0xb   :  { %s1299_s23 = smov 0   ;;  %s1301_s24 = smov 0  }
   0xc LB: > { %1690 = sst [smem:[#allocation12_spill]] %s1227_s19  ;;  %s842_s25 = sadd.s32 4294967295, %s1247_s24   ;;  %s1247_s24 = sphi %s1301_s24, %s23_s24   ;;  %s1243_s23 = sphi %s1299_s23, %s1714_s23   ;;  %s1239_s22 = sphi %s1297_s22, %s1720_s22   ;;  %s1235_s21 = sphi %s1295_s21, %s1712_s21   ;;  %s1231_s20 = sphi %s1293_s20, %s1719_s20   ;;  %s1227_s19 = sphi %s1291_s19, %s1711_s19   ;;  %s1223_s18 = sphi %s1289_s18, %s1718_s18   ;;  %s1219_s17 = sphi %s1287_s17, %s1717_s17   ;;  %s1215_s16 = sphi %s1285_s16, %s1716_s16   ;;  %s1211_s15 = sphi %s1283_s15, %s1715_s15  }
   0xd   : > { %1691 = sst [smem:[#allocation13_spill]] %s1243_s23  ;;  %s843_s26 = sadd.s32 4294967294, %s1247_s24  }
   0xe   : > { %s32_s27 = sadd.s32 1, %s1239_s22  ;;  %s35_s28 = sadd.s32 1, %s1243_s23 }
   0xf   : > { %p33_p0 = scmp.ge.s32.totalorder %s32_s27, 2  ;;  %s44_s29 = sadd.s32 1, %s1227_s19 }
  0x10   : > { %p51_p1 = scmp.ne.s32.totalorder %s1227_s19, %s1223_s18  ;;  %p52_p2 = scmp.eq.s32.totalorder %s1247_s24, 0 }
  0x11   : > { %s1722_s27 = smov (%p33_p0, %s32_s27), 0  ;;  %s1724_s28 = smov (!%p33_p0, %s35_s28), %s1243_s23 }
  0x12   : > { %1692 = sst [smem:[#allocation14_spill]] %s1722_s27  ;;  %s40_s30 = ssub.s32 %s1239_s22, %s1722_s27 }
  0x13   : > { %p1351_p3 = por %p52_p2, %p51_p1  ;;  %p37_p4 = scmp.ge.s32.totalorder %s1724_s28, 2 }
  0x14   : > { %p57_p5 = scmp.ne.s32.totalorder %s1223_s18, %s1219_s17  ;;  %p58_p6 = scmp.eq.s32.totalorder %s842_s25, 0 }
  0x15   : > { %p94_p7 = scmp.eq.s32.totalorder %s40_s30, 0  ;;  %s1726_s28 = smov (%p37_p4, %s1724_s28), 0 }
  0x16   : > { %1694 = sst [smem:[#allocation15_spill]] %s1726_s28  ;;  %p1362_p8 = por %p58_p6, %p57_p5 }
  0x17   : > { %s96_s7 = sadd.s32 1, %s1215_s16  ;;  %s39_s8 = ssub.s32 %s1243_s23, %s1726_s28 }
  0x18   : > { %s1695_s6 = scalar_select %p1362_p8, 1, 0 }
  0x19   : > { %p103_p9 = scmp.ne.s32.totalorder %s1215_s16, %s1211_s15  ;;  %s41_s9 = sor.u32 %s40_s30, %s39_s8 }
  0x1a   : > { %p163_p10 = scmp.eq.s32.totalorder %s842_s25, 3  ;;  %p42_p11 = scmp.eq.s32.totalorder %s41_s9, 0 }
  0x1b   : > { %p1373_p12 = por %p103_p9, %p52_p2  ;;  %p169_p0 = scmp.eq.s32.totalorder %s843_s26, 3 }
  0x1c   : > { %s1378_s11 = scalar_select %p94_p7, %s1215_s16, %s96_s7  }
  0x1d   : > { %s1381_s12 = scalar_select %p42_p11, %s1227_s19, %s44_s29  }
  0x1e   : > { %1697 = sst [smem:[#allocation16_spill]] %s1378_s11  ;;  %p1386_p13 = por %p163_p10, %p51_p1 }
  0x1f   : > { %1698 = sst [smem:[#allocation17_spill]] %s1381_s12  ;;  %p1393_p4 = por %p169_p0, %p57_p5 }
  0x20   : > { %s1699_s13 = scalar_select %p1386_p13, 1, 0 }
  0x21   : > { %s1700_s14 = scalar_select %p1393_p4, 1, 0 }
  0x22   : > { %p845_p2 = scmp.ge.s32.totalorder %s1247_s24, 4 }
  0x23   : > { %1701 = sst [smem:[#allocation18_spill]] %s1700_s14  ;;  %s1399_s25 = sand.u32 (!%p845_p2), 1, %s1227_s19  }
  0x24   : > { %185 = sbr.rel (%p845_p2) target bundleno = 101 (0x65), region = 16  ;;  %s885_s29 = sshll.u32 (!%p845_p2), %s1243_s23, 5 }
  0x25   : > { %s1683_s30 = sshll.u32 (!%p845_p2), %s1399_s25, 7  ;;  %s1404_s26 = sadd.s32 (!%p845_p2), %s1239_s22, %s885_s29 }
  0x26   : > { %s1687_s7 = sshll.u32 (!%p845_p2), %s1404_s26, 7  ;;  %s193_s8 = scalar_lea.vmem (!%p845_p2), [#allocation2], %s1683_s30 }
  0x27   : > { %s202_s9 = sshll.u32 (!%p845_p2), %s193_s8, 4  ;;  %s1702_s0 = sld [smem:[#allocation19_spill]] (!%p845_p2)  ;;  %s1416_s9 = int_to_ptr.vmem [resolvable:$true] %s202_s9 }
  0x28   : > { %s190_s29 = scalar_lea.sflag (!%p845_p2), [#allocation3], %s1399_s25 }
  0x2d   : > { %s1414_s12 = scalar_lea.hbm %s1702_s0, %s1687_s7  ;;  %s1077_s19 = scalar_lea.hbm %s1702_s0, 8192 }
  0x2e   : > { %s1073_s23 = scalar_lea.hbm %s1414_s12, 2048  ;;  %p1078_p7 = scmp.lt.u32.totalorder %s1414_s12, %s1702_s0 }
  0x2f   : > { %p1074_p1 = scmp.ne.s32.totalorder %s1414_s12, %s1073_s23  ;;  %p1079_p9 = scmp.lt.u32.totalorder %s1077_s19, %s1073_s23 }
  0x30   : > { %p1081_p11 = scmp.lt.u32.totalorder %s1073_s23, %s1414_s12 }
  0x31   : > { %p1075_p5 = pnand %p1074_p1, %p1351_p3  ;;  %p1080_p10 = por %p1079_p9, %p1078_p7 }
  0x33   : > { %p1076_p6 = pneg %p1075_p5  ;;  %p1082_p0 = por %p1081_p11, %p1080_p10 }
  0x35   : > { %p1083_p2 = pnand %p1082_p0, %p1076_p6 }
  0x37   : > { %1086 = shalt.err (!%p1083_p2)
}
  0x38   : > { %s1087_s28 = scalar_lea.vmem %s1416_s9, 2048  ;;  %s1249_s30 = smov [#allocation2]  }
  0x39   : > { %p1088_p1 = scmp.ne.s32.totalorder %s1416_s9, %s1087_s28  ;;  %s1091_s8 = sshll.u32 %s1249_s30, 4  ;;  %s1092_s8 = int_to_ptr.vmem [resolvable:$false] %s1091_s8 }
  0x3a   : > { %s1093_s11 = scalar_lea.vmem %s1092_s8, 4096  ;;  %p1094_p13 = scmp.lt.s32.totalorder %s1416_s9, %s1092_s8 }
  0x3b   : > { %p1089_p5 = pnand %p1088_p1, %p1351_p3  ;;  %p1095_p8 = scmp.lt.s32.totalorder %s1093_s11, %s1087_s28 }
  0x3d   : > { %p1090_p4 = pneg %p1089_p5  ;;  %p1096_p7 = por %p1095_p8, %p1094_p13 }
  0x3f   : > { %p1097_p9 = pnand %p1096_p7, %p1090_p4 }
  0x41   : > { %1100 = shalt.err (!%p1097_p9)
}
  0x42   : > { %s1250_s19 = smov 256   ;;  %s1251_s23 = smov 128  }
  0x43   : > { %s1252_s27 = smov 8   ;;  %220 = sbr.rel (!%p1373_p12) target bundleno = 76 (0x4c), region = 28 }
  0x44   : > { %976 = dma.hbm_to_vmem [thread:$0]  (%p1351_p3), %s1414_s12, 2048, %s1416_s9, %s190_s29, %s1250_s19, %s1251_s23, %s1252_s27  }
  0x45   : > { %s222_s28 = sand.u32 (%p1373_p12), 1, %s1215_s16   ;;  %s851_s30 = sshll.u32 (%p1373_p12), %s1239_s22, 3 }
  0x46   : > { %s850_s8 = sshll.u32 (%p1373_p12), %s222_s28, 6  ;;  %s226_s0 = scalar_lea.vmem (%p1373_p12), %s1677_s2, %s851_s30 }
  0x47   : > { %v268_v0 = vld [vmem:[%s226_s0] sm:$0xff] (%p1373_p12)  ;;  %v270_v1 = vld [vmem:[%s226_s0 + $0x10] sm:$0xff] (%p1373_p12)  ;;  %s224_s14 = scalar_lea.vmem (%p1373_p12), [#allocation5], %s850_s8 }
  0x48   : > { %v272_v2 = vld [vmem:[%s226_s0 + $0x20] sm:$0xff] (%p1373_p12)  ;;  %269 = vst [vmem:[%s224_s14] sm:$0xff] (%p1373_p12), %v268_v0  ;;  %271 = vst [vmem:[%s224_s14 + $0x8] sm:$0xff] (%p1373_p12), %v270_v1  ;;  %v274_v3 = vld [vmem:[%s226_s0 + $0x30] sm:$0xff] (%p1373_p12) }
  0x49   : > { %273 = vst [vmem:[%s224_s14 + $0x10] sm:$0xff] (%p1373_p12), %v272_v2  ;;  %v276_v4 = vld [vmem:[%s226_s0 + $0x40] sm:$0xff] (%p1373_p12)  ;;  %v278_v5 = vld [vmem:[%s226_s0 + $0x50] sm:$0xff] (%p1373_p12)  ;;  %275 = vst [vmem:[%s224_s14 + $0x18] sm:$0xff] (%p1373_p12), %v274_v3 }
  0x4a   : > { %277 = vst [vmem:[%s224_s14 + $0x20] sm:$0xff] %v276_v4  ;;  %279 = vst [vmem:[%s224_s14 + $0x28] sm:$0xff] %v278_v5  ;;  %v280_v6 = vld [vmem:[%s226_s0 + $0x60] sm:$0xff]  ;;  %v282_v7 = vld [vmem:[%s226_s0 + $0x70] sm:$0xff] }
  0x4b   : > { %281 = vst [vmem:[%s224_s14 + $0x30] sm:$0xff] %v280_v6  ;;  %283 = vst [vmem:[%s224_s14 + $0x38] sm:$0xff] %v282_v7 }
  0x4c PF: > { %s1703_s10 = sshll.u32 %s1404_s26, 7  ;;  %s1704_s29 = sshll.u32 %s1399_s25, 7 }
  0x4d   : > { %s1457_s9 = scalar_lea.hbm %s1678_s3, %s1703_s10  ;;  %s294_s28 = scalar_lea.vmem [#allocation6], %s1704_s29 }
  0x4e   : > { %s303_s0 = sshll.u32 %s294_s28, 4  ;;  %s291_s14 = scalar_lea.sflag [#allocation7], %s1399_s25  ;;  %s1461_s0 = int_to_ptr.vmem [resolvable:$true] %s303_s0 }
  0x4f   : > { %s1101_s30 = scalar_lea.hbm %s1457_s9, 2048  ;;  %s1105_s11 = scalar_lea.hbm %s1678_s3, 8192 }
  0x50   : > { %p1102_p8 = scmp.ne.s32.totalorder %s1457_s9, %s1101_s30  ;;  %p1106_p4 = scmp.lt.u32.totalorder %s1457_s9, %s1678_s3 }
  0x51   : > { %p1107_p6 = scmp.lt.u32.totalorder %s1105_s11, %s1101_s30  ;;  %p1109_p11 = scmp.lt.u32.totalorder %s1101_s30, %s1457_s9 }
  0x52   : > { %p1103_p12 = pnand %p1102_p8, %p1351_p3 }
  0x53   : > { %p1108_p10 = por %p1107_p6, %p1106_p4 }
  0x54   : > { %p1104_p13 = pneg %p1103_p12 }
  0x55   : > { %p1110_p0 = por %p1109_p11, %p1108_p10 }
  0x57   : > { %p1111_p2 = pnand %p1110_p0, %p1104_p13 }
  0x59   : > { %1114 = shalt.err (!%p1111_p2)
}
  0x5a   : > { %s1115_s7 = scalar_lea.vmem %s1461_s0, 2048  ;;  %s1253_s29 = smov [#allocation6]  }
  0x5b   : > { %p1116_p1 = scmp.ne.s32.totalorder %s1461_s0, %s1115_s7  ;;  %s1119_s28 = sshll.u32 %s1253_s29, 4  ;;  %s1120_s28 = int_to_ptr.vmem [resolvable:$false] %s1119_s28 }
  0x5c   : > { %s1121_s26 = scalar_lea.vmem %s1120_s28, 4096  ;;  %p1122_p9 = scmp.lt.s32.totalorder %s1461_s0, %s1120_s28 }
  0x5d   : > { %p1117_p5 = pnand %p1116_p1, %p1351_p3  ;;  %p1123_p8 = scmp.lt.s32.totalorder %s1121_s26, %s1115_s7 }
  0x5f   : > { %p1118_p7 = pneg %p1117_p5  ;;  %p1124_p12 = por %p1123_p8, %p1122_p9 }
  0x61   : > { %p1125_p4 = pnand %p1124_p12, %p1118_p7 }
  0x63   : > { %1128 = shalt.err (!%p1125_p4)
}
  0x64   : > { %977 = dma.hbm_to_vmem [thread:$0]  (%p1351_p3), %s1457_s9, 2048, %s1461_s0, %s291_s14, %s1250_s19, %s1251_s23, %s1252_s27  }
  0x65 PF: > { %p856_p13 = scmp.ge.s32.totalorder %s1247_s24, 1  ;;  %p311_p6 = scmp.lt.s32.totalorder %s1247_s24, 5 }
  0x67   : > { %p312_p10 = pnand %p856_p13, %p311_p6 }
  0x68   : > { %s1493_s30 = sand.u32 (!%p312_p10), 1, %s1223_s18   ;;  %p1705_p3 = scmp.ne.s32.totalorder (!%p312_p10), %s1695_s6, 0 }
  0x69   : > { %315 = sbr.rel (%p312_p10) target bundleno = 382 (0x17e), region = 70  ;;  %s1496_s5 = sshll.u32 (!%p312_p10), %s1493_s30, 7 }
  0x6a   : > { %s318_s25 = scalar_lea.sflag (!%p312_p10), [#allocation3], %s1493_s30  ;;  %s1500_s8 = scalar_lea.vmem (!%p312_p10), [#allocation2], %s1496_s5 }
  0x70   : > { %1198 = dma.done.wait (%p1705_p3), %s318_s25, 2048  }
  0x71   : > { %1200 = vsyncadd (%p1705_p3), %s318_s25, 4294965248  ;;  %s327_s19 = sand.u32 1, %s1211_s15   ;;  %s334_s9 = scalar_lea.sflag [#allocation7], %s1493_s30 }
  0x72   : > { %s858_s23 = sshll.u32 %s327_s19, 6  ;;  %s1509_s0 = scalar_lea.vmem [#allocation6], %s1496_s5 }
  0x73   : > { %s329_s27 = scalar_lea.vmem [#allocation5], %s858_s23 }
  0x74   : > { %1202 = dma.done.wait (%p1705_p3), %s334_s9, 2048  }
  0x75   : > { %1204 = vsyncadd (%p1705_p3), %s334_s9, 4294965248  ;;  %s861_s14 = sshll.u32 %s1235_s21, 4  ;;  %v401_v8 = vld [vmem:[%s329_s27] sm:$0xff]  ;;  %v402_v9 = vld [vmem:[%s329_s27 + $0x8] sm:$0xff]  ;;  %vm409_vm0 = vcmask 523264   ;;  %s1568_s6 = scalar_lea.vmem [#allocation8], %s1496_s5 }
  0x76   : > { %p378_p11 = scmp.lt.s32.totalorder %s861_s14, 31  ;;  %v403_v10 = vld [vmem:[%s329_s27 + $0x10] sm:$0xff]  ;;  %v952_v11 = vpack.c.bf16 %v402_v9, %v401_v8  ;;  %v404_v12 = vld [vmem:[%s329_s27 + $0x18] sm:$0xff]  ;;  %v405_v14 = vld [vmem:[%s329_s27 + $0x20] sm:$0xff]  ;;  %s887_s7 = sshll.u32 %s1235_s21, 5 }
  0x77   : > { %v956_v13 = vpack.c.bf16 %v404_v12, %v403_v10  ;;  %v406_v15 = vld [vmem:[%s329_s27 + $0x28] sm:$0xff]  ;;  %v407_v19 = vld [vmem:[%s329_s27 + $0x30] sm:$0xff]  ;;  %v408_v20 = vld [vmem:[%s329_s27 + $0x38] sm:$0xff]  ;;  %s1584_s21 = sadd.s32 %s1231_s20, %s887_s7  ;;  %s699_s29 = sshll.u32 %s1568_s6, 4  ;;  %s1611_s29 = int_to_ptr.vmem [resolvable:$true] %s699_s29 }
  0x78   : > { %s1728_s14 = smov (!%p378_p11, %s861_s14), 31  ;;  %953 = vmatprep.subr.bf16.mxu0 %v952_v11  ;;  %968 = vmatprep.subr.bf16.mxu1 %v952_v11  ;;  %v960_v18 = vpack.c.bf16 %v406_v15, %v405_v14  ;;  %v964_v21 = vpack.c.bf16 %v408_v20, %v407_v19  ;;  %v620_v36 = vld [vmem:[%s1509_s0 + $0x8] sm:$0xff]  ;;  %v619_v38 = vld [vmem:[%s1509_s0] sm:$0xff]  ;;  %v622_v52 = vld [vmem:[%s1509_s0 + $0x18] sm:$0xff]  ;;  %s882_s20 = sshll.u32 %s1584_s21, 7 }
  0x79   : > { %s862_s11 = sshll.u32 %s1728_s14, 3  ;;  %955 = vmatpush3.bf16.msra.mxu0 %v952_v11  ;;  %972 = vmatpush3.bf16.msra.mxu1 %v952_v11  ;;  %v628_v37 = vld [vmem:[%s1509_s0 + $0x48] sm:$0xff]  ;;  %v627_v39 = vld [vmem:[%s1509_s0 + $0x40] sm:$0xff]  ;;  %v630_v53 = vld [vmem:[%s1509_s0 + $0x58] sm:$0xff]  ;;  %s1609_s5 = scalar_lea.hbm %s1679_s4, %s882_s20 }
  0x7a   : > { %s1519_s12 = scalar_lea.vmem %s1676_s1, %s862_s11  ;;  %957 = vmatprep.subr.bf16.mxu0 %v956_v13  ;;  %969 = vmatprep.subr.bf16.mxu1 %v956_v13  ;;  %v604_v41 = vld [vmem:[%s1500_s8 + $0x8] sm:$0xff]  ;;  %v603_v47 = vld [vmem:[%s1500_s8] sm:$0xff]  ;;  %v621_v56 = vld [vmem:[%s1509_s0 + $0x10] sm:$0xff]  ;;  %s684_s25 = scalar_lea.sflag [#allocation4], %s1493_s30 }
  0x7b   : > { %v385_v16 = vld [vmem:[%s1519_s12] sm:$0xff]  ;;  %v386_v22 = vld [vmem:[%s1519_s12 + $0x8] sm:$0xff]  ;;  %v387_v24 = vld [vmem:[%s1519_s12 + $0x10] sm:$0xff]  ;;  %p1706_p2 = scmp.ne.s32.totalorder %s1699_s13, 0  ;;  %s1254_s19 = smov [#allocation8]  }
  0x7c   : > { %v393_v17 = vld [vmem:[%s1519_s12 + $0x40] sm:$0xff]  ;;  %928 = vmatprep.mubr.msk.f32.mxu0 %vm409_vm0, %v385_v16  ;;  %v394_v23 = vld [vmem:[%s1519_s12 + $0x48] sm:$0xff]  ;;  %v395_v25 = vld [vmem:[%s1519_s12 + $0x50] sm:$0xff]  ;;  %s1133_s23 = sshll.u32 %s1254_s19, 4  ;;  %s1134_s23 = int_to_ptr.vmem [resolvable:$false] %s1133_s23 }
  0x7d   : > { %940 = vmatprep.mubr.msk.f32.mxu1 %vm409_vm0, %v393_v17  ;;  %959 = vmatpush3.bf16.msra.mxu0 %v956_v13  ;;  %v388_v26 = vld [vmem:[%s1519_s12 + $0x18] sm:$0xff]  ;;  %v389_v28 = vld [vmem:[%s1519_s12 + $0x20] sm:$0xff]  ;;  %v390_v30 = vld [vmem:[%s1519_s12 + $0x28] sm:$0xff]  ;;  %s1135_s27 = scalar_lea.vmem %s1134_s23, 4096  ;;  %p1136_p7 = scmp.lt.s32.totalorder %s1611_s29, %s1134_s23 }
  0x7e   : > { %973 = vmatpush3.bf16.msra.mxu1 %v956_v13  ;;  %961 = vmatprep.subr.bf16.mxu0 %v960_v18  ;;  %v396_v27 = vld [vmem:[%s1519_s12 + $0x58] sm:$0xff]  ;;  %v397_v29 = vld [vmem:[%s1519_s12 + $0x60] sm:$0xff]  ;;  %v398_v31 = vld [vmem:[%s1519_s12 + $0x68] sm:$0xff] }
  0x7f   : > { %970 = vmatprep.subr.bf16.mxu1 %v960_v18  ;;  %v391_v32 = vld [vmem:[%s1519_s12 + $0x30] sm:$0xff]  ;;  %v392_v34 = vld [vmem:[%s1519_s12 + $0x38] sm:$0xff]  ;;  %v612_v43 = vld [vmem:[%s1500_s8 + $0x48] sm:$0xff] }
  0x80   : > { %v399_v33 = vld [vmem:[%s1519_s12 + $0x70] sm:$0xff]  ;;  %v400_v35 = vld [vmem:[%s1519_s12 + $0x78] sm:$0xff]  ;;  %v611_v49 = vld [vmem:[%s1500_s8 + $0x40] sm:$0xff] }
  0x81   : > { %963 = vmatpush3.bf16.msra.mxu0 %v960_v18  ;;  %v629_v57 = vld [vmem:[%s1509_s0 + $0x50] sm:$0xff]  ;;  %v606_v61 = vld [vmem:[%s1500_s8 + $0x18] sm:$0xff]  ;;  %v624_v8 = vld [vmem:[%s1509_s0 + $0x28] sm:$0xff] }
  0x82   : > { %974 = vmatpush3.bf16.msra.mxu1 %v960_v18  ;;  %965 = vmatprep.subr.bf16.mxu0 %v964_v21  ;;  %v614_v63 = vld [vmem:[%s1500_s8 + $0x58] sm:$0xff]  ;;  %v605_v3 = vld [vmem:[%s1500_s8 + $0x10] sm:$0xff]  ;;  %v632_v9 = vld [vmem:[%s1509_s0 + $0x68] sm:$0xff] }
  0x83   : > { %971 = vmatprep.subr.bf16.mxu1 %v964_v21  ;;  %v613_v5 = vld [vmem:[%s1500_s8 + $0x50] sm:$0xff]  ;;  %v623_v12 = vld [vmem:[%s1509_s0 + $0x20] sm:$0xff]  ;;  %v608_v17 = vld [vmem:[%s1500_s8 + $0x28] sm:$0xff] }
  0x84   : > { %v631_v13 = vld [vmem:[%s1509_s0 + $0x60] sm:$0xff]  ;;  %v616_v19 = vld [vmem:[%s1500_s8 + $0x68] sm:$0xff] }
  0x85   : > { %967 = vmatpush3.bf16.msra.mxu0 %v964_v21 }
  0x86   : > { %975 = vmatpush3.bf16.msra.mxu1 %v964_v21 }
  0x88   : > { %929 = vmatmul.mubr.msk.f32.vlgmr.msra.gmra.mrb[0].mxu0 %vm409_vm0, %v386_v22 }
  0x89   : > { %941 = vmatmul.mubr.msk.f32.vlgmr.msra.gmra.mrb[0].mxu1 %vm409_vm0, %v394_v23  ;;  %931 = vmatprep.mubr.msk.f32.mxu0 %vm409_vm0, %v387_v24  ;;  %v607_v23 = vld [vmem:[%s1500_s8 + $0x20] sm:$0xff] }
  0x8a   : > { %943 = vmatprep.mubr.msk.f32.mxu1 %vm409_vm0, %v395_v25  ;;  %v615_v25 = vld [vmem:[%s1500_s8 + $0x60] sm:$0xff] }
  0x8c   : > { %932 = vmatmul.mubr.msk.f32.gmra.mrb[2].mxu0 %vm409_vm0, %v388_v26 }
  0x8d   : > { %944 = vmatmul.mubr.msk.f32.gmra.mrb[2].mxu1 %vm409_vm0, %v396_v27  ;;  %934 = vmatprep.mubr.msk.f32.mxu0 %vm409_vm0, %v389_v28  ;;  %v626_v28 = vld [vmem:[%s1509_s0 + $0x38] sm:$0xff] }
  0x8e   : > { %946 = vmatprep.mubr.msk.f32.mxu1 %vm409_vm0, %v397_v29  ;;  %v634_v29 = vld [vmem:[%s1509_s0 + $0x78] sm:$0xff] }
  0x90   : > { %935 = vmatmul.mubr.msk.f32.gmra.mrb[4].mxu0 %vm409_vm0, %v390_v30 }
  0x91   : > { %947 = vmatmul.mubr.msk.f32.gmra.mrb[4].mxu1 %vm409_vm0, %v398_v31  ;;  %937 = vmatprep.mubr.msk.f32.mxu0 %vm409_vm0, %v391_v32  ;;  %v625_v32 = vld [vmem:[%s1509_s0 + $0x30] sm:$0xff] }
  0x92   : > { %949 = vmatprep.mubr.msk.f32.mxu1 %vm409_vm0, %v399_v33  ;;  %v633_v33 = vld [vmem:[%s1509_s0 + $0x70] sm:$0xff] }
  0x94   : > { %938 = vmatmul.mubr.msk.f32.gmra.mrb[6].mxu0 %vm409_vm0, %v392_v34 }
  0x95   : > { %950 = vmatmul.mubr.msk.f32.gmra.mrb[6].mxu1 %vm409_vm0, %v400_v35 }
 0x15b   : > { %v930_v40 = vpop.f32.mrb[0].mxu0 }
 0x15c   : > { %v942_v42 = vpop.f32.mrb[0].mxu1  ;;  %v636_v44 = vmul.f32 %v930_v40, %v620_v36  ;;  %v524_v46 = vpop.f32.mrb[1].mxu0 }
 0x15d   : > { %v644_v45 = vmul.f32 %v942_v42, %v628_v37  ;;  %v564_v48 = vpop.f32.mrb[1].mxu1  ;;  %v635_v50 = vmul.f32 %v619_v38, %v524_v46  ;;  %v610_v37 = vld [vmem:[%s1500_s8 + $0x38] sm:$0xff] }
 0x15e   : > { %v643_v51 = vmul.f32 %v627_v39, %v564_v48  ;;  %v652_v54 = vadd.f32 %v636_v44, %v604_v41  ;;  %v618_v39 = vld [vmem:[%s1500_s8 + $0x78] sm:$0xff] }
 0x15f   : > { %v660_v55 = vadd.f32 %v644_v45, %v612_v43  ;;  %v651_v58 = vadd.f32 %v635_v50, %v603_v47  ;;  %v933_v60 = vpop.f32.mrb[2].mxu0  ;;  %v609_v43 = vld [vmem:[%s1500_s8 + $0x30] sm:$0xff] }
 0x160   : > { %v659_v59 = vadd.f32 %v643_v51, %v611_v49  ;;  %v945_v62 = vpop.f32.mrb[2].mxu1  ;;  %668 = vst [vmem:[%s1568_s6 + $0x8] sm:$0xff] %v652_v54  ;;  %v638_v0 = vmul.f32 %v933_v60, %v622_v52  ;;  %v534_v2 = vpop.f32.mrb[3].mxu0  ;;  %v617_v45 = vld [vmem:[%s1500_s8 + $0x70] sm:$0xff]  ;;  %s1129_s8 = scalar_lea.vmem %s1611_s29, 2048 }
 0x161   : > { %676 = vst [vmem:[%s1568_s6 + $0x48] sm:$0xff] %v660_v55  ;;  %v646_v1 = vmul.f32 %v945_v62, %v630_v53  ;;  %v574_v4 = vpop.f32.mrb[3].mxu1  ;;  %667 = vst [vmem:[%s1568_s6] sm:$0xff] %v651_v58  ;;  %v637_v6 = vmul.f32 %v621_v56, %v534_v2  ;;  %p1130_p0 = scmp.ne.s32.totalorder %s1611_s29, %s1129_s8  ;;  %p1137_p9 = scmp.lt.s32.totalorder %s1135_s27, %s1129_s8 }
 0x162   : > { %675 = vst [vmem:[%s1568_s6 + $0x40] sm:$0xff] %v659_v59  ;;  %v645_v7 = vmul.f32 %v629_v57, %v574_v4  ;;  %v654_v10 = vadd.f32 %v638_v0, %v606_v61 }
 0x163   : > { %v662_v11 = vadd.f32 %v646_v1, %v614_v63  ;;  %v653_v14 = vadd.f32 %v637_v6, %v605_v3  ;;  %v936_v16 = vpop.f32.mrb[4].mxu0  ;;  %p1131_p1 = pnand %p1130_p0, %p1706_p2  ;;  %p1138_p8 = por %p1137_p9, %p1136_p7 }
 0x164   : > { %v661_v15 = vadd.f32 %v645_v7, %v613_v5  ;;  %v948_v18 = vpop.f32.mrb[4].mxu1  ;;  %670 = vst [vmem:[%s1568_s6 + $0x18] sm:$0xff] %v654_v10  ;;  %v640_v20 = vmul.f32 %v936_v16, %v624_v8  ;;  %v544_v22 = vpop.f32.mrb[5].mxu0 }
 0x165   : > { %678 = vst [vmem:[%s1568_s6 + $0x58] sm:$0xff] %v662_v11  ;;  %v648_v21 = vmul.f32 %v948_v18, %v632_v9  ;;  %v584_v24 = vpop.f32.mrb[5].mxu1  ;;  %669 = vst [vmem:[%s1568_s6 + $0x10] sm:$0xff] %v653_v14  ;;  %v639_v26 = vmul.f32 %v623_v12, %v544_v22  ;;  %p1132_p5 = pneg %p1131_p1 }
 0x166   : > { %677 = vst [vmem:[%s1568_s6 + $0x50] sm:$0xff] %v661_v15  ;;  %v647_v27 = vmul.f32 %v631_v13, %v584_v24  ;;  %v656_v30 = vadd.f32 %v640_v20, %v608_v17 }
 0x167   : > { %v664_v31 = vadd.f32 %v648_v21, %v616_v19  ;;  %v655_v34 = vadd.f32 %v639_v26, %v607_v23  ;;  %v939_v36 = vpop.f32.mrb[6].mxu0  ;;  %p1139_p12 = pnand %p1138_p8, %p1132_p5 }
 0x168   : > { %v663_v35 = vadd.f32 %v647_v27, %v615_v25  ;;  %v951_v38 = vpop.f32.mrb[6].mxu1  ;;  %672 = vst [vmem:[%s1568_s6 + $0x28] sm:$0xff] %v656_v30  ;;  %v642_v40 = vmul.f32 %v939_v36, %v626_v28  ;;  %v554_v42 = vpop.f32.mrb[7].mxu0 }
 0x169   : > { %680 = vst [vmem:[%s1568_s6 + $0x68] sm:$0xff] %v664_v31  ;;  %v650_v41 = vmul.f32 %v951_v38, %v634_v29  ;;  %v594_v44 = vpop.f32.mrb[7].mxu1  ;;  %671 = vst [vmem:[%s1568_s6 + $0x20] sm:$0xff] %v655_v34  ;;  %v641_v46 = vmul.f32 %v625_v32, %v554_v42 }
 0x16a   : > { %679 = vst [vmem:[%s1568_s6 + $0x60] sm:$0xff] %v663_v35  ;;  %v649_v47 = vmul.f32 %v633_v33, %v594_v44  ;;  %v658_v48 = vadd.f32 %v642_v40, %v610_v37 }
 0x16b   : > { %v666_v49 = vadd.f32 %v650_v41, %v618_v39  ;;  %v657_v50 = vadd.f32 %v641_v46, %v609_v43 }
 0x16c   : > { %v665_v51 = vadd.f32 %v649_v47, %v617_v45  ;;  %674 = vst [vmem:[%s1568_s6 + $0x38] sm:$0xff] %v658_v48 }
 0x16d   : > { %682 = vst [vmem:[%s1568_s6 + $0x78] sm:$0xff] %v666_v49  ;;  %673 = vst [vmem:[%s1568_s6 + $0x30] sm:$0xff] %v657_v50 }
 0x16e   : > { %681 = vst [vmem:[%s1568_s6 + $0x70] sm:$0xff] %v665_v51 }
 0x16f   : > { %1142 = shalt.err (!%p1139_p12)
}
 0x170   : > { %s1143_s9 = scalar_lea.hbm %s1609_s5, 2048  ;;  %s1147_s11 = scalar_lea.hbm %s1679_s4, 8192 }
 0x171   : > { %p1144_p4 = scmp.ne.s32.totalorder %s1609_s5, %s1143_s9  ;;  %p1148_p10 = scmp.lt.u32.totalorder %s1609_s5, %s1679_s4 }
 0x172   : > { %p1149_p3 = scmp.lt.u32.totalorder %s1147_s11, %s1143_s9  ;;  %p1151_p0 = scmp.lt.u32.totalorder %s1143_s9, %s1609_s5 }
 0x173   : > { %p1145_p13 = pnand %p1144_p4, %p1706_p2 }
 0x174   : > { %p1150_p11 = por %p1149_p3, %p1148_p10 }
 0x175   : > { %p1146_p6 = pneg %p1145_p13 }
 0x176   : > { %p1152_p1 = por %p1151_p0, %p1150_p11 }
 0x178   : > { %p1153_p5 = pnand %p1152_p1, %p1146_p6 }
 0x17a   : > { %1156 = shalt.err (!%p1153_p5)
}
 0x17b   : > { %s1255_s12 = smov 128   ;;  %s1256_s6 = smov 256  }
 0x17c   : > { %s1257_s7 = smov 8  }
 0x17d   : > { %980 = dma.vmem_to_hbm [thread:$0]  (%p1706_p2), %s1611_s29, 2048, %s1609_s5, %s684_s25, %s1255_s12, %s1256_s6, %s1257_s7  }
 0x17e PF: > { %s1707_s21 = sld [smem:[#allocation18_spill]]  ;;  %p986_p7 = scmp.ge.s32.totalorder %s1247_s24, 2 }
 0x17f   : > { %s714_s20 = sand.u32 1, %s1219_s17  }
 0x180   : > { %s715_s28 = scalar_lea.sflag [#allocation4], %s714_s20 }
 0x184   : > { %p1708_p9 = scmp.ne.s32.totalorder %s1707_s21, 0 }
 0x186   : > { %p983_p8 = pnand %p986_p7, %p1708_p9 }
 0x188   : > { %1206 = dma.done.wait (!%p983_p8), %s715_s28, 2048  }
 0x189   : > { %1208 = vsyncadd (!%p983_p8), %s715_s28, 4294965248  ;;  %s23_s24 = sadd.s32 1, %s1247_s24   ;;  %s1709_s26 = sld [smem:[#allocation16_spill]] }
 0x18a   : > { %p20_p12 = scmp.ge.s32.totalorder %s23_s24, 6   ;;  %s1710_s13 = sld [smem:[#allocation12_spill]] }
 0x18b   : > { %s1711_s19 = sld [smem:[#allocation17_spill]]  ;;  %s1712_s21 = sld [smem:[#allocation13_spill]] }
 0x18c   : > { %s1713_s30 = sld [smem:[#allocation14_spill]]  ;;  %s1714_s23 = sld [smem:[#allocation15_spill]] }
 0x18d   : > { %s1715_s15 = smov %s1215_s16  ;;  %s1717_s17 = smov %s1223_s18 }
 0x18e   : > { %s1719_s20 = smov %s1239_s22  ;;  %22 = sbr.rel (!%p20_p12) target bundleno = 12 (0xc), region = 143 }
 0x18f   : > { %s1716_s16 = smov %s1709_s26 }
 0x190   : > { %s1718_s18 = smov %s1710_s13 }
 0x192   : > { %s1720_s22 = smov %s1713_s30 }
 0x195   :  { %720 = vsyncpa [#allocation3], 1 }
 0x196   :  { %722 = vsyncpa [#allocation3 + $0x1], 1 }
 0x197   :  { %723 = vsyncpa [#allocation7], 1 }
 0x198   :  { %725 = vsyncpa [#allocation7 + $0x1], 1 }
 0x199   :  { %726 = vsyncpa [#allocation4], 1 }
 0x19a   :  { %728 = vsyncpa [#allocation4 + $0x1], 1 }

</bundles_post_ra>
